<compile_context>
chip_gen: v6e
topology: v6e:2x2x1
jax: 0.10.0
libtpu: 0.0.40
codegen_flags: <defaults>
</compile_context>

<pallas_src>
import functools

import jax
import jax.numpy as jnp
from jax.experimental import pallas as pl
from jax.experimental.pallas import tpu as pltpu

INPUT_DIM = 4
HIDDEN_DIM = 64
OUTPUT_DIM = 3

LANES = 128                      # hidden dim padded to a full vreg lane width
SUB = 8                          # f32 sublane granularity
IN_PAD = 8                       # x padded to 8 lanes (not 128)
OUT_PAD = 8                      # output padded to 8 lanes (not 128)

W12_ROWS = IN_PAD + LANES + SUB  # 8 (w1) + 128 (w2) + 8 (b1/b2 rows) = 144
W3_ROWS = LANES + SUB            # 128 (w3) + 8 (b3 row block)        = 136


def _round_up(n, m):
    return ((n + m - 1) // m) * m


def _mlp_kernel(x_ref, w12_ref, w3_ref, o_ref):
    """Fused fc1->ReLU->(drop)->fc2->ReLU->(drop)->fc3 on one batch tile."""
    cdt = w12_ref.dtype                              # MXU operand dtype (f32 or bf16)
    x = x_ref[...]                                   # (tb, 8)

    # Tile-aligned, full-lane views of the packed slabs (zero-cost slices).
    w1 = w12_ref[0:IN_PAD, :]                        # (8, 128)
    w2 = w12_ref[IN_PAD:IN_PAD + LANES, :]           # (128, 128)
    bias12 = w12_ref[IN_PAD + LANES:W12_ROWS, :]     # (8, 128): rows 0/1 = b1/b2
    b1 = bias12[0:1, :].astype(jnp.float32)
    b2 = bias12[1:2, :].astype(jnp.float32)
    w3 = w3_ref[0:LANES, :]                          # (128, 8)
    b3 = w3_ref[LANES:W3_ROWS, :][0:1, :].astype(jnp.float32)   # (1, 8)

    # fc1 + ReLU (padded lanes of h stay exactly 0: zero weights + zero bias)
    h = jnp.dot(x, w1, preferred_element_type=jnp.float32) + b1
    h = jnp.maximum(h, 0.0).astype(cdt)
    # dropout1: eval-mode identity

    # fc2 + ReLU
    h = jnp.dot(h, w2, preferred_element_type=jnp.float32) + b2
    h = jnp.maximum(h, 0.0).astype(cdt)
    # dropout2: eval-mode identity

    # fc3 -> narrow (tb, 8) output (lanes 3..7 are exactly 0; wrapper slices)
    out = jnp.dot(h, w3, preferred_element_type=jnp.float32) + b3
    o_ref[...] = out.astype(o_ref.dtype)


def pack_params(params, dtype=jnp.float32):
    """Pad + pack params into two lane-/tile-aligned slabs.

    Returns:
      w12_slab: (144, 128) = [w1 (8 rows) | w2 (128 rows) | b1,b2 (8 rows)]
      w3_slab:  (136, 8)   = [w3 (128 rows) | b3 (8 rows)]
    """
    w1, b1, w2, b2, w3, b3 = params
    w12 = jnp.zeros((W12_ROWS, LANES), jnp.float32)
    w12 = w12.at[0:INPUT_DIM, 0:HIDDEN_DIM].set(w1)
    w12 = w12.at[IN_PAD:IN_PAD + HIDDEN_DIM, 0:HIDDEN_DIM].set(w2)
    w12 = w12.at[IN_PAD + LANES + 0, 0:HIDDEN_DIM].set(b1.reshape(-1))
    w12 = w12.at[IN_PAD + LANES + 1, 0:HIDDEN_DIM].set(b2.reshape(-1))

    w3s = jnp.zeros((W3_ROWS, OUT_PAD), jnp.float32)
    w3s = w3s.at[0:HIDDEN_DIM, 0:OUTPUT_DIM].set(w3)
    w3s = w3s.at[LANES + 0, 0:OUTPUT_DIM].set(b3.reshape(-1))
    return w12.astype(dtype), w3s.astype(dtype)


@functools.partial(jax.jit, static_argnames=("tile_b",))
def simple_nn_forward(x, w12_slab, w3_slab, tile_b=4096):
    """Run the fused MLP kernel.

    x: (B, INPUT_DIM) float32.  w12_slab/w3_slab: pack_params(...) output; if
    packed as bf16, MXU operands are bf16 (f32 accumulate), halving HBM reads.
    """
    B = x.shape[0]
    compute_dtype = w12_slab.dtype

    # Batch tile: multiple of 8, capped at tile_b; sized so that mid-size
    # batches give >= 2 grid steps (so both v7x TensorCores get work).
    tb = max(SUB, min(tile_b, _round_up(pl.cdiv(B, 2), SUB)))
    n_tiles = pl.cdiv(B, tb)
    b_pad = n_tiles * tb

    # Host-side padding to 8 lanes only (tiny; paid once per call).
    x_pad = jnp.zeros((b_pad, IN_PAD), compute_dtype).at[:B, :INPUT_DIM].set(
        x.astype(compute_dtype))

    out = pl.pallas_call(
        _mlp_kernel,
        out_shape=jax.ShapeDtypeStruct((b_pad, OUT_PAD), jnp.float32),
        grid=(n_tiles,),
        in_specs=[
            pl.BlockSpec((tb, IN_PAD), lambda i: (i, 0)),         # x tile (tb, 8)
            pl.BlockSpec((W12_ROWS, LANES), lambda i: (0, 0)),    # fc1/fc2 slab (resident)
            pl.BlockSpec((W3_ROWS, OUT_PAD), lambda i: (0, 0)),   # fc3 slab (resident)
        ],
        out_specs=pl.BlockSpec((tb, OUT_PAD), lambda i: (i, 0)),
        compiler_params=pltpu.CompilerParams(
            dimension_semantics=("parallel",),  # shard batch tiles across v7x TCs
        ),
    )(x_pad, w12_slab, w3_slab)
    return out[:B, :OUTPUT_DIM]


def init_params(key):
    """Deterministic parameter init (shapes match SimpleNN(4, 64, 3))."""
    k1, k2, k3, k4, k5, k6 = jax.random.split(key, 6)

    # Uniform(-1/sqrt(fan_in), 1/sqrt(fan_in)) like PyTorch's default Linear init.
    def lin(kw, kb, fan_in, fan_out):
        bound = 1.0 / jnp.sqrt(fan_in)
        w = jax.random.uniform(kw, (fan_in, fan_out), jnp.float32, -bound, bound)
        b = jax.random.uniform(kb, (1, fan_out), jnp.float32, -bound, bound)
        return w, b

    w1, b1 = lin(k1, k2, INPUT_DIM, HIDDEN_DIM)
    w2, b2 = lin(k3, k4, HIDDEN_DIM, HIDDEN_DIM)
    w3, b3 = lin(k5, k6, HIDDEN_DIM, OUTPUT_DIM)
    return (w1, b1, w2, b2, w3, b3)


def reference_forward(x, params):
    w1, b1, w2, b2, w3, b3 = params
    h = jnp.maximum(x @ w1 + b1, 0.0)
    h = jnp.maximum(h @ w2 + b2, 0.0)
    return h @ w3 + b3


if __name__ == "__main__":
    key = jax.random.PRNGKey(0)
    kx, kp = jax.random.split(key)
    params = init_params(kp)

    # --- f32 path (validated to tight tolerance on all generations) ---------
    batch = 8
    x = jax.random.normal(kx, (batch, INPUT_DIM), jnp.float32)
    w12_f32, w3_f32 = pack_params(params, jnp.float32)
    out = jax.block_until_ready(simple_nn_forward(x, w12_f32, w3_f32))
    ref = reference_forward(x, params)
    assert out.shape == (batch, OUTPUT_DIM), out.shape
    assert jnp.allclose(out, ref, atol=1e-5, rtol=1e-5), "f32 mismatch vs reference"

    # --- multi-tile grid path (batch not a multiple of the tile) ------------
    batch2 = 200
    x2 = jax.random.normal(jax.random.PRNGKey(1), (batch2, INPUT_DIM), jnp.float32)
    out2 = jax.block_until_ready(simple_nn_forward(x2, w12_f32, w3_f32))
    ref2 = reference_forward(x2, params)
    assert out2.shape == (batch2, OUTPUT_DIM), out2.shape
    assert jnp.allclose(out2, ref2, atol=1e-5, rtol=1e-5), "grid-path mismatch"

    # --- optional bf16 MXU-operand path (v6e/v7x HBM saving; looser check) --
    w12_bf, w3_bf = pack_params(params, jnp.bfloat16)
    out_bf = jax.block_until_ready(simple_nn_forward(x, w12_bf, w3_bf))
    assert out_bf.shape == (batch, OUTPUT_DIM), out_bf.shape
    assert bool(jnp.all(jnp.isfinite(out_bf))), "bf16 path produced non-finite values"
    assert jnp.allclose(out_bf, ref, atol=1e-1, rtol=1e-1), "bf16 path way off"

    print("KERNEL_OK")
</pallas_src>

<mosaic_0001>
module attributes {stable_mosaic.version = 11 : i64} {
  func.func @_mlp_kernel(%arg0: i32, %arg1: memref<8x8xf32, #tpu.memory_space<vmem>>, %arg2: memref<144x128xf32, #tpu.memory_space<vmem>>, %arg3: memref<136x8xf32, #tpu.memory_space<vmem>>, %arg4: memref<8x8xf32, #tpu.memory_space<vmem>>) attributes {dimension_semantics = [#tpu.dimension_semantics<parallel>], iteration_bounds = array<i64: 1>, scalar_prefetch = 0 : i64, scratch_operands = 0 : i64, tpu.core_type = #tpu.core_type<tc>, window_params = [{transform_indices = @transform_0, window_bounds = array<i64: 8, 8>}, {pipeline_mode = #tpu.pipeline_mode<synchronous>, transform_indices = @transform_1, window_bounds = array<i64: 144, 128>}, {pipeline_mode = #tpu.pipeline_mode<synchronous>, transform_indices = @transform_2, window_bounds = array<i64: 136, 8>}, {transform_indices = @transform_3, window_bounds = array<i64: 8, 8>}]} {
    %c0 = arith.constant 0 : index
    %c0_0 = arith.constant 0 : index
    %0 = vector.load %arg1[%c0, %c0_0] : memref<8x8xf32, #tpu.memory_space<vmem>>, vector<8x8xf32>
    %c0_1 = arith.constant 0 : index
    %c0_2 = arith.constant 0 : index
    %1 = vector.load %arg2[%c0_1, %c0_2] : memref<144x128xf32, #tpu.memory_space<vmem>>, vector<8x128xf32>
    %c8 = arith.constant 8 : index
    %c0_3 = arith.constant 0 : index
    %2 = vector.load %arg2[%c8, %c0_3] : memref<144x128xf32, #tpu.memory_space<vmem>>, vector<128x128xf32>
    %c136 = arith.constant 136 : index
    %c0_4 = arith.constant 0 : index
    %3 = vector.load %arg2[%c136, %c0_4] : memref<144x128xf32, #tpu.memory_space<vmem>>, vector<8x128xf32>
    %4 = vector.extract_strided_slice %3 {offsets = [0, 0], sizes = [1, 128], strides = [1, 1]} : vector<8x128xf32> to vector<1x128xf32>
    %5 = vector.extract_strided_slice %3 {offsets = [1, 0], sizes = [1, 128], strides = [1, 1]} : vector<8x128xf32> to vector<1x128xf32>
    %c0_5 = arith.constant 0 : index
    %c0_6 = arith.constant 0 : index
    %6 = vector.load %arg3[%c0_5, %c0_6] : memref<136x8xf32, #tpu.memory_space<vmem>>, vector<128x8xf32>
    %c128 = arith.constant 128 : index
    %c0_7 = arith.constant 0 : index
    %7 = vector.load %arg3[%c128, %c0_7] : memref<136x8xf32, #tpu.memory_space<vmem>>, vector<8x8xf32>
    %8 = vector.extract_strided_slice %7 {offsets = [0, 0], sizes = [1, 8], strides = [1, 1]} : vector<8x8xf32> to vector<1x8xf32>
    %cst = arith.constant dense<0.000000e+00> : vector<8x128xf32>
    %9 = tpu.matmul %0, %1, %cst {dimension_numbers = #tpu.dot_dimension_numbers<[1], [0], [0], [1], [0, 0, 1, 1], [], []>} : vector<8x8xf32>, vector<8x128xf32>, vector<8x128xf32> -> vector<8x128xf32>
    %10 = vector.broadcast %4 : vector<1x128xf32> to vector<8x128xf32>
    %11 = arith.addf %9, %10 : vector<8x128xf32>
    %cst_8 = arith.constant 0.000000e+00 : f32
    %12 = vector.broadcast %cst_8 : f32 to vector<8x128xf32>
    %13 = arith.maximumf %11, %12 : vector<8x128xf32>
    %cst_9 = arith.constant dense<0.000000e+00> : vector<8x128xf32>
    %14 = tpu.matmul %13, %2, %cst_9 {dimension_numbers = #tpu.dot_dimension_numbers<[1], [0], [0], [1], [0, 0, 1, 1], [], []>} : vector<8x128xf32>, vector<128x128xf32>, vector<8x128xf32> -> vector<8x128xf32>
    %15 = vector.broadcast %5 : vector<1x128xf32> to vector<8x128xf32>
    %16 = arith.addf %14, %15 : vector<8x128xf32>
    %cst_10 = arith.constant 0.000000e+00 : f32
    %17 = vector.broadcast %cst_10 : f32 to vector<8x128xf32>
    %18 = arith.maximumf %16, %17 : vector<8x128xf32>
    %cst_11 = arith.constant dense<0.000000e+00> : vector<8x8xf32>
    %19 = tpu.matmul %18, %6, %cst_11 {dimension_numbers = #tpu.dot_dimension_numbers<[1], [0], [0], [1], [0, 0, 1, 1], [], []>} : vector<8x128xf32>, vector<128x8xf32>, vector<8x8xf32> -> vector<8x8xf32>
    %20 = vector.broadcast %8 : vector<1x8xf32> to vector<8x8xf32>
    %21 = arith.addf %19, %20 : vector<8x8xf32>
    %c0_12 = arith.constant 0 : index
    %c0_13 = arith.constant 0 : index
    %22 = vector.load %arg4[%c0_12, %c0_13] : memref<8x8xf32, #tpu.memory_space<vmem>>, vector<8x8xf32>
    tpu.vector_store %arg4[%c0_12, %c0_13], %21 {strides = array<i32>} : memref<8x8xf32, #tpu.memory_space<vmem>>, vector<8x8xf32>,
    return
  }
  func.func @transform_0(%arg0: i32) -> (i32, i32) {
    %c0_i32 = arith.constant 0 : i32
    %c0_i32_0 = arith.constant 0 : i32
    return %arg0, %c0_i32 : i32, i32
  }
  func.func @transform_1(%arg0: i32) -> (i32, i32) {
    %c0_i32 = arith.constant 0 : i32
    %c0_i32_0 = arith.constant 0 : i32
    %c0_i32_1 = arith.constant 0 : i32
    return %c0_i32, %c0_i32_0 : i32, i32
  }
  func.func @transform_2(%arg0: i32) -> (i32, i32) {
    %c0_i32 = arith.constant 0 : i32
    %c0_i32_0 = arith.constant 0 : i32
    %c0_i32_1 = arith.constant 0 : i32
    return %c0_i32, %c0_i32_0 : i32, i32
  }
  func.func @transform_3(%arg0: i32) -> (i32, i32) {
    %c0_i32 = arith.constant 0 : i32
    %c0_i32_0 = arith.constant 0 : i32
    return %arg0, %c0_i32 : i32, i32
  }
}

</mosaic_0001>

<bundles_post_ra>
// kernel: simple_nn_forward.1
= control target key start
LH: loop header
LB: loop body
LE: loop exit
PB: predicated region body
PF: predicated region fallthrough
CT: control target
= control target key end

     0   :  { %vm54_vm0 = vcmask 64512   ;;  %v397_v0 = vmov 0.0   ;;  %vm398_vm1 = vmmov 0   ;;  %v50_v32 = vlaneseq  ;;  %s571_s1 = inlined_call_operand.vmem [shape: f32[144,128], index: 1, kind: input, shape index: {}]   ;;  %s572_s0 = inlined_call_operand.vmem [shape: f32[8,8], index: 0, kind: input, shape index: {}]   ;;  %s573_s2 = inlined_call_operand.vmem [shape: f32[136,8], index: 2, kind: input, shape index: {}]   ;;  %s574_s3 = inlined_call_operand.vmem [shape: f32[8,8], index: 3, kind: output, shape index: {}]  }
   0x1   :  { %320 = vmatprep.subr.mxu0 %v397_v0  ;;  %v15_v1 = vld [vmem:[%s571_s1] sm:$0xff]  ;;  %322 = vmatprep.mubr.msk.f32.mxu0 %vm398_vm1, %v397_v0  ;;  %v30_v4 = vld [vmem:[%s571_s1 + $0x78] sm:$0xff]  ;;  %v29_v5 = vld [vmem:[%s571_s1 + $0x70] sm:$0xff] }
   0x2   :  { %v14_v2 = vld [vmem:[%s572_s0] sm:$0xff]  ;;  %321 = vmatpush3.msra.mxu0 %v15_v1  ;;  %325 = vmatprep.subr.mxu1 %v397_v0  ;;  %v28_v6 = vld [vmem:[%s571_s1 + $0x68] sm:$0xff]  ;;  %v26_v8 = vld [vmem:[%s571_s1 + $0x58] sm:$0xff]  ;;  %v51_v33 = vshrl.u32 %v50_v32, 7 }
   0x3   :  { %v31_v3 = vld [vmem:[%s571_s1 + $0x80] sm:$0xff]  ;;  %323 = vmatmul.mubr.msk.f32.vlgmr.msra.gmra.mxu0 %vm54_vm0, %v14_v2  ;;  %357 = vmatprep.mubr.msk.f32.mxu1 %vm398_vm1, %v397_v0  ;;  %v25_v9 = vld [vmem:[%s571_s1 + $0x50] sm:$0xff]  ;;  %v24_v10 = vld [vmem:[%s571_s1 + $0x48] sm:$0xff] }
   0x4   :  { %326 = vmatpush3.msra.mxu1 %v31_v3  ;;  %360 = vmatprep.subr.mxu0 %v397_v0  ;;  %v27_v7 = vld [vmem:[%s571_s1 + $0x60] sm:$0xff]  ;;  %v22_v12 = vld [vmem:[%s571_s1 + $0x38] sm:$0xff]  ;;  %v21_v13 = vld [vmem:[%s571_s1 + $0x30] sm:$0xff]  ;;  %v52_v34 = vsub.s32 0, %v51_v33  ;;  %v131_v44 = vsub.s32 1, %v51_v33 }
   0x5   :  { %327 = vmatprep.subr.mxu1 %v397_v0  ;;  %392 = vmatprep.mubr.msk.f32.mxu0 %vm398_vm1, %v397_v0  ;;  %v23_v11 = vld [vmem:[%s571_s1 + $0x40] sm:$0xff]  ;;  %v20_v14 = vld [vmem:[%s571_s1 + $0x28] sm:$0xff]  ;;  %v18_v16 = vld [vmem:[%s571_s1 + $0x18] sm:$0xff] }
   0x6   :  { %328 = vmatpush3.msra.mxu1 %v30_v4  ;;  %v19_v15 = vld [vmem:[%s571_s1 + $0x20] sm:$0xff]  ;;  %v17_v17 = vld [vmem:[%s571_s1 + $0x10] sm:$0xff]  ;;  %v16_v18 = vld [vmem:[%s571_s1 + $0x8] sm:$0xff] }
   0x7   :  { %329 = vmatprep.subr.mxu1 %v397_v0  ;;  %v48_v19 = vld [vmem:[%s573_s2 + $0x78] sm:$0xff]  ;;  %v47_v20 = vld [vmem:[%s573_s2 + $0x70] sm:$0xff]  ;;  %v46_v21 = vld [vmem:[%s573_s2 + $0x68] sm:$0xff] }
   0x8   :  { %330 = vmatpush3.msra.mxu1 %v29_v5  ;;  %361 = vmatpush3.msra.mxu0 %v48_v19  ;;  %v45_v22 = vld [vmem:[%s573_s2 + $0x60] sm:$0xff]  ;;  %v44_v23 = vld [vmem:[%s573_s2 + $0x58] sm:$0xff]  ;;  %v43_v24 = vld [vmem:[%s573_s2 + $0x50] sm:$0xff] }
   0x9   :  { %331 = vmatprep.subr.mxu1 %v397_v0  ;;  %362 = vmatprep.subr.mxu0 %v397_v0  ;;  %v42_v25 = vld [vmem:[%s573_s2 + $0x48] sm:$0xff]  ;;  %v41_v26 = vld [vmem:[%s573_s2 + $0x40] sm:$0xff]  ;;  %v40_v27 = vld [vmem:[%s573_s2 + $0x38] sm:$0xff] }
   0xa   :  { %332 = vmatpush3.msra.mxu1 %v28_v6  ;;  %363 = vmatpush3.msra.mxu0 %v47_v20  ;;  %v39_v28 = vld [vmem:[%s573_s2 + $0x30] sm:$0xff]  ;;  %v38_v29 = vld [vmem:[%s573_s2 + $0x28] sm:$0xff]  ;;  %v37_v30 = vld [vmem:[%s573_s2 + $0x20] sm:$0xff] }
   0xb   :  { %333 = vmatprep.subr.mxu1 %v397_v0  ;;  %364 = vmatprep.subr.mxu0 %v397_v0  ;;  %v36_v31 = vld [vmem:[%s573_s2 + $0x18] sm:$0xff]  ;;  %v32_v35 = vld [vmem:[%s571_s1 + $0x88] sm:$0xff]  ;;  %v35_v41 = vld [vmem:[%s573_s2 + $0x10] sm:$0xff] }
   0xc   :  { %334 = vmatpush3.msra.mxu1 %v27_v7  ;;  %365 = vmatpush3.msra.mxu0 %v46_v21  ;;  %v53_v36 = vrot.slane %v32_v35, %v52_v34  ;;  %v34_v42 = vld [vmem:[%s573_s2 + $0x8] sm:$0xff]  ;;  %v33_v43 = vld [vmem:[%s573_s2] sm:$0xff]  ;;  %v132_v45 = vrot.slane %v32_v35, %v131_v44 }
   0xd   :  { %335 = vmatprep.subr.mxu1 %v397_v0  ;;  %366 = vmatprep.subr.mxu0 %v397_v0  ;;  %v49_v50 = vld [vmem:[%s573_s2 + $0x80] sm:$0xff] }
   0xe   :  { %336 = vmatpush3.msra.mxu1 %v26_v8  ;;  %367 = vmatpush3.msra.mxu0 %v45_v22  ;;  %v207_v51 = vrot.slane %v49_v50, %v52_v34 }
   0xf   :  { %337 = vmatprep.subr.mxu1 %v397_v0  ;;  %368 = vmatprep.subr.mxu0 %v397_v0 }
  0x10   :  { %338 = vmatpush3.msra.mxu1 %v25_v9  ;;  %369 = vmatpush3.msra.mxu0 %v44_v23 }
  0x11   :  { %339 = vmatprep.subr.mxu1 %v397_v0  ;;  %370 = vmatprep.subr.mxu0 %v397_v0 }
  0x12   :  { %340 = vmatpush3.msra.mxu1 %v24_v10  ;;  %371 = vmatpush3.msra.mxu0 %v43_v24 }
  0x13   :  { %341 = vmatprep.subr.mxu1 %v397_v0  ;;  %372 = vmatprep.subr.mxu0 %v397_v0 }
  0x14   :  { %342 = vmatpush3.msra.mxu1 %v23_v11  ;;  %373 = vmatpush3.msra.mxu0 %v42_v25 }
  0x15   :  { %343 = vmatprep.subr.mxu1 %v397_v0  ;;  %374 = vmatprep.subr.mxu0 %v397_v0 }
  0x16   :  { %344 = vmatpush3.msra.mxu1 %v22_v12  ;;  %375 = vmatpush3.msra.mxu0 %v41_v26 }
  0x17   :  { %345 = vmatprep.subr.mxu1 %v397_v0  ;;  %376 = vmatprep.subr.mxu0 %v397_v0 }
  0x18   :  { %346 = vmatpush3.msra.mxu1 %v21_v13  ;;  %377 = vmatpush3.msra.mxu0 %v40_v27 }
  0x19   :  { %347 = vmatprep.subr.mxu1 %v397_v0  ;;  %378 = vmatprep.subr.mxu0 %v397_v0 }
  0x1a   :  { %348 = vmatpush3.msra.mxu1 %v20_v14  ;;  %379 = vmatpush3.msra.mxu0 %v39_v28 }
  0x1b   :  { %349 = vmatprep.subr.mxu1 %v397_v0  ;;  %380 = vmatprep.subr.mxu0 %v397_v0 }
  0x1c   :  { %350 = vmatpush3.msra.mxu1 %v19_v15  ;;  %381 = vmatpush3.msra.mxu0 %v38_v29 }
  0x1d   :  { %351 = vmatprep.subr.mxu1 %v397_v0  ;;  %382 = vmatprep.subr.mxu0 %v397_v0 }
  0x1e   :  { %352 = vmatpush3.msra.mxu1 %v18_v16  ;;  %383 = vmatpush3.msra.mxu0 %v37_v30 }
  0x1f   :  { %353 = vmatprep.subr.mxu1 %v397_v0  ;;  %384 = vmatprep.subr.mxu0 %v397_v0 }
  0x20   :  { %354 = vmatpush3.msra.mxu1 %v17_v17  ;;  %385 = vmatpush3.msra.mxu0 %v36_v31 }
  0x21   :  { %355 = vmatprep.subr.mxu1 %v397_v0  ;;  %386 = vmatprep.subr.mxu0 %v397_v0 }
  0x22   :  { %356 = vmatpush3.msra.mxu1 %v16_v18  ;;  %387 = vmatpush3.msra.mxu0 %v35_v41 }
  0x23   :  { %388 = vmatprep.subr.mxu0 %v397_v0 }
  0x24   :  { %389 = vmatpush3.msra.mxu0 %v34_v42 }
  0x25   :  { %390 = vmatprep.subr.mxu0 %v397_v0 }
  0x26   :  { %391 = vmatpush3.msra.mxu0 %v33_v43 }
  0xc3   :  { %v124_v37 = vpop.f32.mrf.mxu0 }
  0xc4   :  { %v125_v38 = vadd.f32 %v124_v37, %v53_v36 }
  0xc5   :  { %v324_v39 = vpop.f32.mrf.mxu0 }
  0xc6   :  { %v128_v40 = vmax.f32 %v125_v38, 0.0 }
  0xc8   :  { %358 = vmatmul.mubr.f32.vlgmr.msra.gmra.mxu1 %v128_v40 }
 0x188   :  { %v199_v46 = vpop.f32.mrf.mxu1 }
 0x189   :  { %v200_v47 = vadd.f32 %v199_v46, %v132_v45 }
 0x18a   :  { %v359_v48 = vpop.f32.mrf.mxu1 }
 0x18b   :  { %v203_v49 = vmax.f32 %v200_v47, 0.0 }
 0x18d   :  { %393 = vmatmul.mubr.f32.vlgmr.msra.gmra.mxu0 %v203_v49 }
 0x24d   :  { %v274_v52 = vpop.f32.mrf.mxu0 }
 0x24e   :  { %v275_v53 = vadd.f32 %v274_v52, %v207_v51 }
 0x24f   :  { %v394_v54 = vpop.f32.mrf.mxu0 }
 0x250   :  { %278 = vst.msk [vmem:[%s574_s3] sm:$0xff] %vm54_vm0, %v275_v53 }

</bundles_post_ra>
